<compile_context>
chip_gen: v7x
topology: tpu7x:2x2x1
jax: 0.10.0
libtpu: 0.0.40
codegen_flags: <defaults>
</compile_context>

<pallas_src>
import functools
import numpy as np
import jax
import jax.numpy as jnp
from jax.experimental import pallas as pl
from jax.experimental.pallas import tpu as pltpu


# ----------------------------------------------------------------------------
# DFT operator matrices (built once per (H, W) on the host, cached on device).
# Entries that are mathematically zero (sin/cos at multiples of pi/2) are
# snapped to exact 0 so structurally-real FFT bins keep an exactly-zero
# imaginary part (matches torch.angle branch cuts) even after the bf16 cast.
# ----------------------------------------------------------------------------
def _dft_1d(n):
    k = np.arange(n, dtype=np.float64)
    ang = -2.0 * np.pi * np.outer(k, k) / n          # F[j,h] = exp(-2*pi*i*j*h/n)
    re, im = np.cos(ang), np.sin(ang)
    re[np.abs(re) < 1e-9] = 0.0
    im[np.abs(im) < 1e-9] = 0.0
    return re, im


@functools.lru_cache(maxsize=8)
def _dft_operators(h, w):
    """Cached bf16 device constants for row-major flattened (h, w) planes.

    mcat  (HW, 2HW):  x_flat @ mcat            = [ re(fft2) | im(fft2) ]
    micat (2HW, HW):  [fr | fi] @ micat        = real(ifft2(fr + i*fi))   (1/HW folded)
    (Mr and Mi are symmetric, so the inverse operator is just the stacked form.)
    """
    fhr, fhi = _dft_1d(h)
    fwr, fwi = _dft_1d(w)
    mr = np.kron(fhr, fwr) - np.kron(fhi, fwi)       # (HW, HW)
    mi = np.kron(fhr, fwi) + np.kron(fhi, fwr)
    hw = float(h * w)
    mcat = np.concatenate([mr, mi], axis=1)          # (HW, 2HW)
    micat = np.concatenate([mr, mi], axis=0) / hw    # (2HW, HW), 1/HW folded in
    return (jnp.asarray(mcat, jnp.bfloat16),
            jnp.asarray(micat, jnp.bfloat16))


# ----------------------------------------------------------------------------
# In-kernel atan2 built from plain VPU ops (no atan/atan2 primitive needed).
# Polynomial: Abramowitz & Stegun 4.4.49, |error| < 1e-5 rad on [0, 1].
# Branch cuts match torch.angle / IEEE atan2 (x<0,y=0 -> pi; x=y=0 -> 0; ...).
# ----------------------------------------------------------------------------
def _arctan2(y, x):
    abs_y = jnp.abs(y)
    abs_x = jnp.abs(x)
    mx = jnp.maximum(abs_x, abs_y)
    mn = jnp.minimum(abs_x, abs_y)
    a = mn / jnp.where(mx == 0.0, 1.0, mx)           # in [0, 1]
    s = a * a
    p = 0.0208351
    p = p * s - 0.0851330
    p = p * s + 0.1801410
    p = p * s - 0.3302995
    p = p * s + 0.9998660
    r = p * a                                        # atan(a), a in [0, 1]
    r = jnp.where(abs_y > abs_x, (np.pi / 2.0) - r, r)
    r = jnp.where(x < 0.0, np.pi - r, r)
    return jnp.where(y < 0.0, -r, r)


# ----------------------------------------------------------------------------
# Fused kernel: single invocation (grid=()), batch folded into the row (M) dim.
#   x_ref    (B*C, HW)   f32
#   mcat_ref (HW, 2HW)   bf16     forward DFT operator  [Mr | Mi]
#   micat_ref(2HW, HW)   bf16     inverse operator      [[Mr],[Mi]] / HW
#   wfp_ref  (2BO, 2BC)  f32      block-diag(freq conv, phase conv) over batch
#   bfp_ref  (2BO, 1)    f32
#   wc_ref   (BO, BO)    f32      block-diag(combine conv) over batch
#   bc_ref   (BO, 1)     f32
#   out_ref  (BO, HW)    f32
# ----------------------------------------------------------------------------
def _fpsa_kernel(x_ref, mcat_ref, micat_ref, wfp_ref, bfp_ref, wc_ref, bc_ref,
                 out_ref, *, hw, rows_half):
    x = x_ref[...]                                                   # (BC, HW)

    # fft2 as one lane-dense bf16 matmul producing [re | im].
    reim = jnp.dot(x.astype(jnp.bfloat16), mcat_ref[...],
                   preferred_element_type=jnp.float32)               # (BC, 2HW)
    re = reim[:, :hw]
    im = reim[:, hw:]

    amp = jnp.sqrt(re * re + im * im)                                # torch.abs(fft)
    phase = _arctan2(im, re)                                         # torch.angle(fft)

    # freq_attn + phase_attn 1x1 convs merged into ONE block-diagonal matmul.
    ap = jnp.concatenate([amp, phase], axis=0)                       # (2BC, HW)
    lin = (jnp.dot(wfp_ref[...], ap, preferred_element_type=jnp.float32)
           + bfp_ref[...])                                           # (2BO, HW)
    amp_attn = jnp.maximum(lin[:rows_half], 0.0)                     # ReLU branch
    ps = jax.nn.sigmoid(lin[rows_half:])                             # Sigmoid branch

    # amp_attn * exp(i*ps), then real(ifft2): one bf16 matmul (1/HW pre-folded).
    frfi = jnp.concatenate([amp_attn * jnp.cos(ps),
                            amp_attn * jnp.sin(ps)], axis=1)         # (BO, 2HW)
    sp = jnp.dot(frfi.astype(jnp.bfloat16), micat_ref[...],
                 preferred_element_type=jnp.float32)                 # (BO, HW)

    # combine 1x1 conv on (spatial_output + x); residual requires O == C.
    out_ref[...] = (jnp.dot(wc_ref[...], sp + x,
                            preferred_element_type=jnp.float32)
                    + bc_ref[...])


# ----------------------------------------------------------------------------
# Jitted wrapper: param prep (block-diag weights, tiled biases), reshapes and
# the single pallas_call all live under one jit.
# ----------------------------------------------------------------------------
@jax.jit
def _fpsa_apply(x, mcat, micat, params):
    B, C, H, W = x.shape
    O = params["w_comb"].shape[0]
    HW = H * W
    eye_b = jnp.eye(B, dtype=jnp.float32)

    # Block-diagonal-over-batch conv weights; freq & phase stacked block-diag too.
    wf_big = jnp.kron(eye_b, params["w_freq"])                       # (BO, BC)
    wp_big = jnp.kron(eye_b, params["w_phase"])                      # (BO, BC)
    zero = jnp.zeros((B * O, B * C), jnp.float32)
    wfp = jnp.concatenate(
        [jnp.concatenate([wf_big, zero], axis=1),
         jnp.concatenate([zero, wp_big], axis=1)], axis=0)           # (2BO, 2BC)
    bfp = jnp.concatenate([jnp.tile(params["b_freq"], B),
                           jnp.tile(params["b_phase"], B)])[:, None] # (2BO, 1)
    wc = jnp.kron(eye_b, params["w_comb"])                           # (BO, BO)
    bc = jnp.tile(params["b_comb"], B)[:, None]                      # (BO, 1)

    x2 = x.astype(jnp.float32).reshape(B * C, HW)

    vmem = pl.BlockSpec(memory_space=pltpu.MemorySpace.VMEM)
    out2 = pl.pallas_call(
        functools.partial(_fpsa_kernel, hw=HW, rows_half=B * O),
        out_shape=jax.ShapeDtypeStruct((B * O, HW), jnp.float32),
        in_specs=[vmem] * 7,
        out_specs=vmem,
    )(x2, mcat, micat, wfp, bfp, wc, bc)

    return out2.reshape(B, O, H, W)


def fpsa_forward(x, params):
    B, C, H, W = x.shape
    O = params["w_comb"].shape[0]
    # The residual 'spatial_output + x' and the combine conv require O == C.
    assert O == C, "FPSA requires out_channels == in_channels for the residual"
    assert params["w_freq"].shape == (O, C) and params["w_phase"].shape == (O, C)
    mcat, micat = _dft_operators(H, W)       # cached: built & uploaded once per (H, W)
    return _fpsa_apply(x, mcat, micat, params)


# ----------------------------------------------------------------------------
# Deterministic parameter init (shapes as in FPSA.__init__).  BatchNorm is
# folded assuming eval mode with default stats (mean=0, var=1, gamma=1, beta=0).
# ----------------------------------------------------------------------------
def init_params(key, c_in, c_out):
    ks = jax.random.split(key, 6)
    bi, bo = 1.0 / np.sqrt(c_in), 1.0 / np.sqrt(c_out)
    w_freq = jax.random.uniform(ks[0], (c_out, c_in), jnp.float32, -bi, bi)
    b_freq = jax.random.uniform(ks[1], (c_out,), jnp.float32, -bi, bi)
    w_phase = jax.random.uniform(ks[2], (c_out, c_in), jnp.float32, -bi, bi)
    b_phase = jax.random.uniform(ks[3], (c_out,), jnp.float32, -bi, bi)
    w_comb = jax.random.uniform(ks[4], (c_out, c_out), jnp.float32, -bo, bo)
    b_comb = jax.random.uniform(ks[5], (c_out,), jnp.float32, -bo, bo)
    bn_scale = 1.0 / np.sqrt(1.0 + 1e-5)             # gamma / sqrt(running_var + eps)
    return dict(
        w_freq=w_freq * bn_scale, b_freq=b_freq * bn_scale,
        w_phase=w_phase * bn_scale, b_phase=b_phase * bn_scale,
        w_comb=w_comb, b_comb=b_comb,
    )


# ----------------------------------------------------------------------------
# Pure-JAX reference (separable DFT formulation, HIGHEST precision, exact atan2)
# for validation.
# ----------------------------------------------------------------------------
def fpsa_reference(x, params):
    x = x.astype(jnp.float32)
    B, C, H, W = x.shape
    hp = jax.lax.Precision.HIGHEST
    fhr_np, fhi_np = _dft_1d(H)
    fwr_np, fwi_np = _dft_1d(W)
    fhr, fhi = jnp.asarray(fhr_np, jnp.float32), jnp.asarray(fhi_np, jnp.float32)
    fwr, fwi = jnp.asarray(fwr_np, jnp.float32), jnp.asarray(fwi_np, jnp.float32)

    a = jnp.einsum("jh,bchw->bcjw", fhr, x, precision=hp)
    b = jnp.einsum("jh,bchw->bcjw", fhi, x, precision=hp)
    re = (jnp.einsum("bcjw,wv->bcjv", a, fwr, precision=hp)
          - jnp.einsum("bcjw,wv->bcjv", b, fwi, precision=hp))
    im = (jnp.einsum("bcjw,wv->bcjv", a, fwi, precision=hp)
          + jnp.einsum("bcjw,wv->bcjv", b, fwr, precision=hp))
    amp = jnp.sqrt(re * re + im * im)
    phase = jnp.arctan2(im, re)

    def conv1x1(z, w, bias):
        return (jnp.einsum("oc,bcjv->bojv", w, z, precision=hp)
                + bias[None, :, None, None])

    amp_attn = jnp.maximum(conv1x1(amp, params["w_freq"], params["b_freq"]), 0.0)
    ps = jax.nn.sigmoid(conv1x1(phase, params["w_phase"], params["b_phase"]))
    fr = amp_attn * jnp.cos(ps)
    fi = amp_attn * jnp.sin(ps)

    p = (jnp.einsum("hj,bojv->bohv", fhr, fr, precision=hp)
         + jnp.einsum("hj,bojv->bohv", fhi, fi, precision=hp))
    q = (jnp.einsum("hj,bojv->bohv", fhr, fi, precision=hp)
         - jnp.einsum("hj,bojv->bohv", fhi, fr, precision=hp))
    sp = (jnp.einsum("bohv,vw->bohw", p, fwr, precision=hp)
          + jnp.einsum("bohv,vw->bohw", q, fwi, precision=hp)) / (H * W)

    return conv1x1(sp + x, params["w_comb"], params["b_comb"])


if __name__ == "__main__":
    B, C, H, W = 2, 4, 16, 16
    key = jax.random.PRNGKey(0)
    kx, kp = jax.random.split(key)
    x = jax.random.normal(kx, (B, C, H, W), jnp.float32)
    params = init_params(kp, C, C)

    out = fpsa_forward(x, params)
    out = jax.block_until_ready(out)

    ref = fpsa_reference(x, params)
    err = float(jnp.max(jnp.abs(out - ref)))
    assert out.shape == (B, C, H, W)
    assert np.isfinite(err) and err < 2e-2, f"mismatch vs reference: {err}"
    print("KERNEL_OK")
</pallas_src>

<mosaic_0001>
module attributes {stable_mosaic.version = 11 : i64} {
  func.func @_fpsa_kernel(%arg0: memref<8x256xf32, #tpu.memory_space<vmem>>, %arg1: memref<256x512xbf16, #tpu.memory_space<vmem>>, %arg2: memref<512x256xbf16, #tpu.memory_space<vmem>>, %arg3: memref<16x16xf32, #tpu.memory_space<vmem>>, %arg4: memref<16x1xf32, #tpu.memory_space<vmem>>, %arg5: memref<8x8xf32, #tpu.memory_space<vmem>>, %arg6: memref<8x1xf32, #tpu.memory_space<vmem>>, %arg7: memref<8x256xf32, #tpu.memory_space<vmem>>) attributes {dimension_semantics = [], scalar_prefetch = 0 : i64, scratch_operands = 0 : i64, tpu.core_type = #tpu.core_type<tc>} {
    %c0 = arith.constant 0 : index
    %c0_0 = arith.constant 0 : index
    %0 = vector.load %arg0[%c0, %c0_0] : memref<8x256xf32, #tpu.memory_space<vmem>>, vector<8x256xf32>
    %1 = arith.truncf %0 : vector<8x256xf32> to vector<8x256xbf16>
    %c0_1 = arith.constant 0 : index
    %c0_2 = arith.constant 0 : index
    %2 = vector.load %arg1[%c0_1, %c0_2] : memref<256x512xbf16, #tpu.memory_space<vmem>>, vector<256x512xbf16>
    %cst = arith.constant dense<0.000000e+00> : vector<8x512xf32>
    %3 = tpu.matmul %1, %2, %cst {dimension_numbers = #tpu.dot_dimension_numbers<[1], [0], [0], [1], [0, 0, 1, 1], [], []>} : vector<8x256xbf16>, vector<256x512xbf16>, vector<8x512xf32> -> vector<8x512xf32>
    %4 = vector.extract_strided_slice %3 {offsets = [0, 0], sizes = [8, 256], strides = [1, 1]} : vector<8x512xf32> to vector<8x256xf32>
    %5 = vector.extract_strided_slice %3 {offsets = [0, 256], sizes = [8, 256], strides = [1, 1]} : vector<8x512xf32> to vector<8x256xf32>
    %6 = arith.mulf %4, %4 : vector<8x256xf32>
    %7 = arith.mulf %5, %5 : vector<8x256xf32>
    %8 = arith.addf %6, %7 : vector<8x256xf32>
    %9 = math.sqrt %8 : vector<8x256xf32>
    %10 = math.absf %5 : vector<8x256xf32>
    %11 = math.absf %4 : vector<8x256xf32>
    %12 = arith.maximumf %11, %10 : vector<8x256xf32>
    %13 = arith.minimumf %11, %10 : vector<8x256xf32>
    %cst_3 = arith.constant 0.000000e+00 : f32
    %14 = vector.broadcast %cst_3 : f32 to vector<8x256xf32>
    %15 = arith.cmpf oeq, %12, %14 : vector<8x256xf32>
    %cst_4 = arith.constant 1.000000e+00 : f32
    %16 = vector.broadcast %cst_4 : f32 to vector<8x256xf32>
    %17 = arith.select %15, %16, %12 : vector<8x256xi1>, vector<8x256xf32>
    %18 = arith.divf %13, %17 : vector<8x256xf32>
    %19 = arith.mulf %18, %18 : vector<8x256xf32>
    %cst_5 = arith.constant 2.083510e-02 : f32
    %20 = vector.broadcast %cst_5 : f32 to vector<8x256xf32>
    %21 = arith.mulf %20, %19 : vector<8x256xf32>
    %cst_6 = arith.constant 8.513300e-02 : f32
    %22 = vector.broadcast %cst_6 : f32 to vector<8x256xf32>
    %23 = arith.subf %21, %22 : vector<8x256xf32>
    %24 = arith.mulf %23, %19 : vector<8x256xf32>
    %cst_7 = arith.constant 1.801410e-01 : f32
    %25 = vector.broadcast %cst_7 : f32 to vector<8x256xf32>
    %26 = arith.addf %24, %25 : vector<8x256xf32>
    %27 = arith.mulf %26, %19 : vector<8x256xf32>
    %cst_8 = arith.constant 0.330299497 : f32
    %28 = vector.broadcast %cst_8 : f32 to vector<8x256xf32>
    %29 = arith.subf %27, %28 : vector<8x256xf32>
    %30 = arith.mulf %29, %19 : vector<8x256xf32>
    %cst_9 = arith.constant 9.998660e-01 : f32
    %31 = vector.broadcast %cst_9 : f32 to vector<8x256xf32>
    %32 = arith.addf %30, %31 : vector<8x256xf32>
    %33 = arith.mulf %32, %18 : vector<8x256xf32>
    %34 = arith.cmpf ogt, %10, %11 : vector<8x256xf32>
    %cst_10 = arith.constant 1.57079637 : f32
    %35 = vector.broadcast %cst_10 : f32 to vector<8x256xf32>
    %36 = arith.subf %35, %33 : vector<8x256xf32>
    %37 = arith.select %34, %36, %33 : vector<8x256xi1>, vector<8x256xf32>
    %cst_11 = arith.constant 0.000000e+00 : f32
    %38 = vector.broadcast %cst_11 : f32 to vector<8x256xf32>
    %39 = arith.cmpf olt, %4, %38 : vector<8x256xf32>
    %cst_12 = arith.constant 3.14159274 : f32
    %40 = vector.broadcast %cst_12 : f32 to vector<8x256xf32>
    %41 = arith.subf %40, %37 : vector<8x256xf32>
    %42 = arith.select %39, %41, %37 : vector<8x256xi1>, vector<8x256xf32>
    %cst_13 = arith.constant 0.000000e+00 : f32
    %43 = vector.broadcast %cst_13 : f32 to vector<8x256xf32>
    %44 = arith.cmpf olt, %5, %43 : vector<8x256xf32>
    %cst_14 = arith.constant 0.000000e+00 : f32
    %45 = vector.broadcast %cst_14 : f32 to vector<8x256xf32>
    %46 = arith.subf %45, %42 : vector<8x256xf32>
    %47 = arith.select %44, %46, %42 : vector<8x256xi1>, vector<8x256xf32>
    %48 = tpu.concatenate %9, %47 in 0 : vector<8x256xf32>, vector<8x256xf32> -> vector<16x256xf32>
    %c0_15 = arith.constant 0 : index
    %c0_16 = arith.constant 0 : index
    %49 = vector.load %arg3[%c0_15, %c0_16] : memref<16x16xf32, #tpu.memory_space<vmem>>, vector<16x16xf32>
    %cst_17 = arith.constant dense<0.000000e+00> : vector<16x256xf32>
    %50 = tpu.matmul %49, %48, %cst_17 {dimension_numbers = #tpu.dot_dimension_numbers<[1], [0], [0], [1], [0, 0, 1, 1], [], []>} : vector<16x16xf32>, vector<16x256xf32>, vector<16x256xf32> -> vector<16x256xf32>
    %c0_18 = arith.constant 0 : index
    %c0_19 = arith.constant 0 : index
    %51 = vector.load %arg4[%c0_18, %c0_19] : memref<16x1xf32, #tpu.memory_space<vmem>>, vector<16x1xf32>
    %52 = vector.broadcast %51 : vector<16x1xf32> to vector<16x256xf32>
    %53 = arith.addf %50, %52 : vector<16x256xf32>
    %54 = vector.extract_strided_slice %53 {offsets = [0, 0], sizes = [8, 256], strides = [1, 1]} : vector<16x256xf32> to vector<8x256xf32>
    %cst_20 = arith.constant 0.000000e+00 : f32
    %55 = vector.broadcast %cst_20 : f32 to vector<8x256xf32>
    %56 = arith.maximumf %54, %55 : vector<8x256xf32>
    %57 = vector.extract_strided_slice %53 {offsets = [8, 0], sizes = [8, 256], strides = [1, 1]} : vector<16x256xf32> to vector<8x256xf32>
    %58 = arith.negf %57 : vector<8x256xf32>
    %59 = math.exp %58 : vector<8x256xf32>
    %cst_21 = arith.constant 1.000000e+00 : f32
    %60 = vector.broadcast %cst_21 : f32 to vector<8x256xf32>
    %61 = arith.addf %60, %59 : vector<8x256xf32>
    %62 = arith.divf %60, %61 : vector<8x256xf32>
    %63 = math.cos %62 : vector<8x256xf32>
    %64 = arith.mulf %56, %63 : vector<8x256xf32>
    %65 = math.sin %62 : vector<8x256xf32>
    %66 = arith.mulf %56, %65 : vector<8x256xf32>
    %67 = tpu.concatenate %64, %66 in 1 : vector<8x256xf32>, vector<8x256xf32> -> vector<8x512xf32>
    %68 = arith.truncf %67 : vector<8x512xf32> to vector<8x512xbf16>
    %c0_22 = arith.constant 0 : index
    %c0_23 = arith.constant 0 : index
    %69 = vector.load %arg2[%c0_22, %c0_23] : memref<512x256xbf16, #tpu.memory_space<vmem>>, vector<512x256xbf16>
    %cst_24 = arith.constant dense<0.000000e+00> : vector<8x256xf32>
    %70 = tpu.matmul %68, %69, %cst_24 {dimension_numbers = #tpu.dot_dimension_numbers<[1], [0], [0], [1], [0, 0, 1, 1], [], []>} : vector<8x512xbf16>, vector<512x256xbf16>, vector<8x256xf32> -> vector<8x256xf32>
    %c0_25 = arith.constant 0 : index
    %c0_26 = arith.constant 0 : index
    %71 = vector.load %arg5[%c0_25, %c0_26] : memref<8x8xf32, #tpu.memory_space<vmem>>, vector<8x8xf32>
    %72 = arith.addf %70, %0 : vector<8x256xf32>
    %cst_27 = arith.constant dense<0.000000e+00> : vector<8x256xf32>
    %73 = tpu.matmul %71, %72, %cst_27 {dimension_numbers = #tpu.dot_dimension_numbers<[1], [0], [0], [1], [0, 0, 1, 1], [], []>} : vector<8x8xf32>, vector<8x256xf32>, vector<8x256xf32> -> vector<8x256xf32>
    %c0_28 = arith.constant 0 : index
    %c0_29 = arith.constant 0 : index
    %74 = vector.load %arg6[%c0_28, %c0_29] : memref<8x1xf32, #tpu.memory_space<vmem>>, vector<8x1xf32>
    %75 = vector.broadcast %74 : vector<8x1xf32> to vector<8x256xf32>
    %76 = arith.addf %73, %75 : vector<8x256xf32>
    %c0_30 = arith.constant 0 : index
    %c0_31 = arith.constant 0 : index
    %77 = vector.load %arg7[%c0_30, %c0_31] : memref<8x256xf32, #tpu.memory_space<vmem>>, vector<8x256xf32>
    tpu.vector_store %arg7[%c0_30, %c0_31], %76 {strides = array<i32>} : memref<8x256xf32, #tpu.memory_space<vmem>>, vector<8x256xf32>,
    return
  }
}

</mosaic_0001>

<bundles_post_ra>
// kernel: tile.28
= control target key start
LH: loop header
LB: loop body
LE: loop exit
PB: predicated region body
PF: predicated region fallthrough
CT: control target
= control target key end

     0   :  { %s22_s0 = inlined_call_operand.vmem [shape: f32[4], index: 0, kind: input, shape index: {}]   ;;  %s23_s1 = inlined_call_operand.vmem [shape: f32[2,4], index: 1, kind: output, shape index: {}]  }
   0x1   :  { %v4_v0 = vld [vmem:[%s22_s0] ss:$0 sm:$0xff] }
   0x2   :  { %5 = vst [vmem:[%s23_s1] sm:$0x3] %v4_v0 }

// kernel: tile.19
= control target key start
LH: loop header
LB: loop body
LE: loop exit
PB: predicated region body
PF: predicated region fallthrough
CT: control target
= control target key end

     0   :  { %vm7_vm0 = vcmask 31744   ;;  %vm13_vm1 = vcmask 64544   ;;  %s39_s0 = inlined_call_operand.vmem [shape: f32[2,4], index: 0, kind: input, shape index: {}]   ;;  %s40_s1 = inlined_call_operand.vmem [shape: f32[8], index: 1, kind: output, shape index: {}]  }
   0x1   :  { %v4_v0 = vld [vmem:[%s39_s0] sm:$0x3]  ;;  %s22_s0 = smov 4  }
   0x2   :  { %5 = vst [vmem:[#allocation1] sm:$0x3] %v4_v0 }
   0x9   :  { %v10_v1 = vld [vmem:[#allocation1 + $0x1] sm:$0x1]   ;;  %v6_v2 = vld [vmem:[#allocation1] sm:$0x1]  }
   0xa   :  { %11 = vrot.lane.b32.xlu0 %v10_v1, %s22_s0  ;;  %8 = vst.msk [vmem:[#allocation0] sm:$0x1] %vm7_vm0, %v6_v2  }
  0x7c   :  { %v12_v3 = vpop.permute.xlu0 %11  }
  0x7d   :  { %14 = vst.msk [vmem:[#allocation0] sm:$0x1] %vm13_vm1, %v12_v3  }
  0x84   :  { %v18_v4 = vld [vmem:[#allocation0] sm:$0x1] }
  0x85   :  { %20 = vst [vmem:[%s40_s1] sm:$0x1] %v18_v4 }

// kernel: tile.0
= control target key start
LH: loop header
LB: loop body
LE: loop exit
PB: predicated region body
PF: predicated region fallthrough
CT: control target
= control target key end

     0   :  { %s34_s8 = smov 125   ;;  %vm7_vm0 = vcmask 7168   ;;  %s35_s11 = smov 126   ;;  %s61_s0 = inlined_call_operand.vmem [shape: f32[2,4], index: 0, kind: input, shape index: {}]   ;;  %s62_s1 = inlined_call_operand.vmem [shape: f32[8,1], index: 1, kind: output, shape index: {}]  }
   0x1   :  { %v4_v0 = vld [vmem:[%s61_s0] sm:$0x3]  ;;  %s33_s0 = smov 127  }
   0x2   :  { %5 = vst [vmem:[#allocation0] sm:$0x3] %v4_v0 }
   0x9   :  { %v9_v1 = vld [vmem:[#allocation0] sm:$0x3]  }
   0xa   :  { %v21_v2 = vld [vmem:[#allocation0] sm:$0x3]   ;;  %10 = vrot.lane.b32.xlu0 %v9_v1, %s33_s0 }
   0xb   :  { %22 = vrot.lane.b32.xlu1 %v21_v2, %s34_s8  ;;  %v6_v3 = vld [vmem:[#allocation0] sm:$0x3]  }
   0xc   :  { %v15_v4 = vld [vmem:[#allocation0] sm:$0x3]   ;;  %8 = vst.msk [vmem:[%s62_s1] ss:$4 sm:$0x3] %vm7_vm0, %v6_v3  }
   0xe   :  { %16 = vrot.lane.b32.xlu0 %v15_v4, %s35_s11 }
  0x7c   :  { %v11_v5 = vpop.permute.xlu0 %10  }
  0x7d   :  { %v23_v6 = vpop.permute.xlu1 %22   ;;  %27 = vst.msk [vmem:[%s62_s1 + $0x1] ss:$4 sm:$0x3] %vm7_vm0, %v11_v5  }
  0x7e   :  { %29 = vst.msk [vmem:[%s62_s1 + $0x3] ss:$4 sm:$0x3] %vm7_vm0, %v23_v6  }
  0x80   :  { %v17_v7 = vpop.permute.xlu0 %16  }
  0x81   :  { %28 = vst.msk [vmem:[%s62_s1 + $0x2] ss:$4 sm:$0x3] %vm7_vm0, %v17_v7  }

// kernel: _fpsa_apply.1
= control target key start
LH: loop header
LB: loop body
LE: loop exit
PB: predicated region body
PF: predicated region fallthrough
CT: control target
= control target key end

     0   :  { %12 = vsyncpa [#allocation3], 0  ;;  %s2390_s0 = inlined_call_operand.vmem [shape: f32[8,256], index: 0, kind: input, shape index: {}]   ;;  %s2391_s1 = inlined_call_operand.hbm [shape: bf16[256,512], index: 1, kind: input, shape index: {}]   ;;  %s2392_s2 = inlined_call_operand.hbm [shape: bf16[512,256], index: 2, kind: input, shape index: {}]   ;;  %s2393_s3 = inlined_call_operand.vmem [shape: f32[16,16], index: 3, kind: input, shape index: {}]   ;;  %s2394_s4 = inlined_call_operand.vmem [shape: f32[16,1], index: 4, kind: input, shape index: {}]   ;;  %s2395_s5 = inlined_call_operand.vmem [shape: f32[8,8], index: 5, kind: input, shape index: {}]   ;;  %s2396_s6 = inlined_call_operand.vmem [shape: f32[8,1], index: 6, kind: input, shape index: {}]   ;;  %s2397_s7 = inlined_call_operand.vmem [shape: f32[8,256], index: 7, kind: output, shape index: {}]  }
   0x1   :  { %13 = vsyncpa [#allocation5], 0  ;;  %s2141_s24 = smov [#allocation2]   ;;  %s2093_s28 = scalar_lea.hbm %s2391_s1, 8192 }
   0x2   :  { %s21_s25 = sshll.u32 %s2141_s24, 4  ;;  %p2094_p0 = scmp.ne.s32.totalorder %s2391_s1, %s2093_s28  ;;  %s22_s25 = int_to_ptr.vmem [resolvable:$true] %s21_s25 }
   0x3   :  { %p2097_p1 = scmp.lt.u32.totalorder %s2093_s28, %s2391_s1 }
   0x5   :  { %p2099_p2 = pnand %p2097_p1, %p2094_p0 }
   0x7   :  { %2102 = shalt.err (!%p2099_p2)
}
   0x8   :  { %s2103_s10 = scalar_lea.vmem %s22_s25, 8192  ;;  %p2108_p4 = scmp.lt.s32.totalorder %s22_s25, %s22_s25 }
   0x9   :  { %p2104_p3 = scmp.ne.s32.totalorder %s22_s25, %s2103_s10  ;;  %p2109_p5 = scmp.lt.s32.totalorder %s2103_s10, %s2103_s10 }
   0xb   :  { %p2110_p6 = por %p2109_p5, %p2108_p4 }
   0xd   :  { %p2111_p7 = pnand %p2110_p6, %p2104_p3 }
   0xf   :  { %2114 = shalt.err (!%p2111_p7)
}
  0x10   :  { %s2142_s11 = smov 256   ;;  %s2143_s12 = smov 16  }
  0x11   :  { %27 = dma.hbm_to_vmem [thread:$0]  %s2391_s1, 8192, %s22_s25, [#allocation3], %s2142_s11, %s2142_s11, %s2143_s12  }
  0x12   :  { %s2144_s15 = smov [#allocation4]   ;;  %s2115_s19 = scalar_lea.hbm %s2392_s2, 8192 }
  0x13   :  { %s33_s16 = sshll.u32 %s2144_s15, 4  ;;  %p2116_p8 = scmp.ne.s32.totalorder %s2392_s2, %s2115_s19  ;;  %s34_s16 = int_to_ptr.vmem [resolvable:$true] %s33_s16 }
  0x14   :  { %p2119_p9 = scmp.lt.u32.totalorder %s2115_s19, %s2392_s2 }
  0x16   :  { %p2121_p10 = pnand %p2119_p9, %p2116_p8 }
  0x18   :  { %2124 = shalt.err (!%p2121_p10)
}
  0x19   :  { %s2125_s24 = scalar_lea.vmem %s34_s16, 8192  ;;  %p2130_p12 = scmp.lt.s32.totalorder %s34_s16, %s34_s16 }
  0x1a   :  { %p2126_p11 = scmp.ne.s32.totalorder %s34_s16, %s2125_s24  ;;  %p2131_p13 = scmp.lt.s32.totalorder %s2125_s24, %s2125_s24 }
  0x1c   :  { %p2132_p0 = por %p2131_p13, %p2130_p12 }
  0x1e   :  { %p2133_p1 = pnand %p2132_p0, %p2126_p11 }
  0x20   :  { %2136 = shalt.err (!%p2133_p1)
}
  0x21   :  { %s2145_s1 = smov 128   ;;  %s2146_s25 = smov 8  }
  0x22   :  { %39 = dma.hbm_to_vmem [thread:$0]  %s2392_s2, 8192, %s34_s16, [#allocation5], %s2145_s1, %s2145_s1, %s2146_s25  }
  0x23   :  { %2137 = dma.done.wait [#allocation3], 8192  }
  0x24   :  { %2138 = vsyncadd [#allocation3], 4294959104 }
  0x25   :  { %2139 = dma.done.wait [#allocation5], 8192  }
  0x26   :  { %2140 = vsyncadd [#allocation5], 4294959104  ;;  %v1875_v0 = vld [vmem:[#allocation2 + $0x4] ss:$16 sps:$4 sm:$0xff]   ;;  %v1877_v1 = vld [vmem:[#allocation2] ss:$16 sps:$4 sm:$0xff]  }
  0x27   :  { %442 = vmatprep.subr.bf16.mxu0 %v1875_v0  ;;  %v1878_v2 = vld [vmem:[#allocation2 + $0x24] ss:$16 sps:$4 sm:$0xff]   ;;  %v1880_v3 = vld [vmem:[#allocation2 + $0x20] ss:$16 sps:$4 sm:$0xff]   ;;  %v55_v13 = vld [vmem:[%s2390_s0 + $0x8] sm:$0xff]  ;;  %vm612_vm12 = vcmask 130048  }
  0x28   :  { %443 = vmatpush1.bf16.msra.mxu0 %v1877_v1  ;;  %v1881_v4 = vld [vmem:[#allocation2 + $0x44] ss:$16 sps:$4 sm:$0xff]   ;;  %v1883_v5 = vld [vmem:[#allocation2 + $0x40] ss:$16 sps:$4 sm:$0xff]   ;;  %v57_v14 = vpack.c.bf16 %v55_v13, %v55_v13  ;;  %v1925_v35 = vld [vmem:[#allocation2 + $0xc] ss:$16 sps:$4 sm:$0xff]  }
  0x29   :  { %444 = vmatprep.subr.bf16.mxu0 %v1878_v2  ;;  %v1884_v6 = vld [vmem:[#allocation2 + $0x64] ss:$16 sps:$4 sm:$0xff]   ;;  %v1886_v7 = vld [vmem:[#allocation2 + $0x60] ss:$16 sps:$4 sm:$0xff]   ;;  %v1923_v36 = vld [vmem:[#allocation2 + $0x8] ss:$16 sps:$4 sm:$0xff]  }
  0x2a   :  { %v1887_v8 = vld [vmem:[#allocation2 + $0x84] ss:$16 sps:$4 sm:$0xff]   ;;  %v1889_v9 = vld [vmem:[#allocation2 + $0x80] ss:$16 sps:$4 sm:$0xff]   ;;  %474 = vmatprep.mubr.bf16.mxu0 %v57_v14  ;;  %v1928_v38 = vld [vmem:[#allocation2 + $0x2c] ss:$16 sps:$4 sm:$0xff]  }
  0x2b   :  { %v1890_v10 = vld [vmem:[#allocation2 + $0xa4] ss:$16 sps:$4 sm:$0xff]   ;;  %v1892_v11 = vld [vmem:[#allocation2 + $0xa0] ss:$16 sps:$4 sm:$0xff]   ;;  %v1926_v39 = vld [vmem:[#allocation2 + $0x28] ss:$16 sps:$4 sm:$0xff]  }
  0x2c   :  { %445 = vmatpush1.bf16.msra.mxu0 %v1880_v3  ;;  %v1893_v12 = vld [vmem:[#allocation2 + $0xc4] ss:$16 sps:$4 sm:$0xff]   ;;  %v1895_v15 = vld [vmem:[#allocation2 + $0xc0] ss:$16 sps:$4 sm:$0xff]   ;;  %v1931_v40 = vld [vmem:[#allocation2 + $0x4c] ss:$16 sps:$4 sm:$0xff]  }
  0x2d   :  { %446 = vmatprep.subr.bf16.mxu0 %v1881_v4  ;;  %v1896_v16 = vld [vmem:[#allocation2 + $0xe4] ss:$16 sps:$4 sm:$0xff]   ;;  %v1898_v17 = vld [vmem:[#allocation2 + $0xe0] ss:$16 sps:$4 sm:$0xff]   ;;  %v1929_v41 = vld [vmem:[#allocation2 + $0x48] ss:$16 sps:$4 sm:$0xff]  }
  0x2e   :  { %v1899_v18 = vld [vmem:[#allocation2 + $0x104] ss:$16 sps:$4 sm:$0xff]   ;;  %v1901_v19 = vld [vmem:[#allocation2 + $0x100] ss:$16 sps:$4 sm:$0xff]   ;;  %v1934_v42 = vld [vmem:[#allocation2 + $0x6c] ss:$16 sps:$4 sm:$0xff]  }
  0x2f   :  { %v1902_v20 = vld [vmem:[#allocation2 + $0x124] ss:$16 sps:$4 sm:$0xff]   ;;  %v1904_v21 = vld [vmem:[#allocation2 + $0x120] ss:$16 sps:$4 sm:$0xff]   ;;  %v1932_v43 = vld [vmem:[#allocation2 + $0x68] ss:$16 sps:$4 sm:$0xff]  }
  0x30   :  { %447 = vmatpush1.bf16.msra.mxu0 %v1883_v5  ;;  %v1905_v22 = vld [vmem:[#allocation2 + $0x144] ss:$16 sps:$4 sm:$0xff]   ;;  %v1907_v23 = vld [vmem:[#allocation2 + $0x140] ss:$16 sps:$4 sm:$0xff]   ;;  %v1937_v44 = vld [vmem:[#allocation2 + $0x8c] ss:$16 sps:$4 sm:$0xff]  }
  0x31   :  { %448 = vmatprep.subr.bf16.mxu0 %v1884_v6  ;;  %v1908_v24 = vld [vmem:[#allocation2 + $0x164] ss:$16 sps:$4 sm:$0xff]   ;;  %v1910_v25 = vld [vmem:[#allocation2 + $0x160] ss:$16 sps:$4 sm:$0xff]   ;;  %v1935_v45 = vld [vmem:[#allocation2 + $0x88] ss:$16 sps:$4 sm:$0xff]  }
  0x32   :  { %v1911_v26 = vld [vmem:[#allocation2 + $0x184] ss:$16 sps:$4 sm:$0xff]   ;;  %v1913_v27 = vld [vmem:[#allocation2 + $0x180] ss:$16 sps:$4 sm:$0xff]   ;;  %v1940_v46 = vld [vmem:[#allocation2 + $0xac] ss:$16 sps:$4 sm:$0xff]  }
  0x33   :  { %v1914_v28 = vld [vmem:[#allocation2 + $0x1a4] ss:$16 sps:$4 sm:$0xff]   ;;  %v1916_v29 = vld [vmem:[#allocation2 + $0x1a0] ss:$16 sps:$4 sm:$0xff]   ;;  %v1938_v47 = vld [vmem:[#allocation2 + $0xa8] ss:$16 sps:$4 sm:$0xff]  }
  0x34   :  { %449 = vmatpush1.bf16.msra.mxu0 %v1886_v7  ;;  %v1917_v30 = vld [vmem:[#allocation2 + $0x1c4] ss:$16 sps:$4 sm:$0xff]   ;;  %v1919_v31 = vld [vmem:[#allocation2 + $0x1c0] ss:$16 sps:$4 sm:$0xff]   ;;  %v1943_v48 = vld [vmem:[#allocation2 + $0xcc] ss:$16 sps:$4 sm:$0xff]  }
  0x35   :  { %450 = vmatprep.subr.bf16.mxu0 %v1887_v8  ;;  %v1920_v32 = vld [vmem:[#allocation2 + $0x1e4] ss:$16 sps:$4 sm:$0xff]   ;;  %v1922_v33 = vld [vmem:[#allocation2 + $0x1e0] ss:$16 sps:$4 sm:$0xff]   ;;  %v1941_v49 = vld [vmem:[#allocation2 + $0xc8] ss:$16 sps:$4 sm:$0xff]  }
  0x36   :  { %v54_v34 = vld [vmem:[%s2390_s0] sm:$0xff]  ;;  %v1946_v50 = vld [vmem:[#allocation2 + $0xec] ss:$16 sps:$4 sm:$0xff]   ;;  %v1944_v51 = vld [vmem:[#allocation2 + $0xe8] ss:$16 sps:$4 sm:$0xff]   ;;  %v2147_v4 = vmov 0.0  }
  0x37   :  { %v2225_v37 = vpack.c.bf16 %v54_v34, %v54_v34  ;;  %v1949_v52 = vld [vmem:[#allocation2 + $0x10c] ss:$16 sps:$4 sm:$0xff]   ;;  %v1947_v53 = vld [vmem:[#allocation2 + $0x108] ss:$16 sps:$4 sm:$0xff]   ;;  %683 = vmatprep.mubr.f32.mxu1 %v2147_v4  ;;  %v2148_v6 = vmov 0   ;;  %v600_v7 = vld [vmem:[%s2394_s4] sm:$0xff] }
  0x38   :  { %451 = vmatpush1.bf16.msra.mxu0 %v1889_v9  ;;  %v1952_v54 = vld [vmem:[#allocation2 + $0x12c] ss:$16 sps:$4 sm:$0xff]   ;;  %v1950_v55 = vld [vmem:[#allocation2 + $0x128] ss:$16 sps:$4 sm:$0xff]   ;;  %1873 = vset.pattern.permute.xlu0 %v2148_v6 }
  0x39   :  { %452 = vmatprep.subr.bf16.mxu0 %v1890_v10  ;;  %v1955_v56 = vld [vmem:[#allocation2 + $0x14c] ss:$16 sps:$4 sm:$0xff]   ;;  %v1953_v57 = vld [vmem:[#allocation2 + $0x148] ss:$16 sps:$4 sm:$0xff]   ;;  %1874 = vset.pattern.permute.xlu1 %v2148_v6 }
  0x3a   :  { %v1958_v58 = vld [vmem:[#allocation2 + $0x16c] ss:$16 sps:$4 sm:$0xff]   ;;  %v1956_v59 = vld [vmem:[#allocation2 + $0x168] ss:$16 sps:$4 sm:$0xff]  }
  0x3b   :  { %v1961_v60 = vld [vmem:[#allocation2 + $0x18c] ss:$16 sps:$4 sm:$0xff]   ;;  %v1959_v61 = vld [vmem:[#allocation2 + $0x188] ss:$16 sps:$4 sm:$0xff]  }
  0x3c   :  { %453 = vmatpush1.bf16.msra.mxu0 %v1892_v11  ;;  %v1964_v62 = vld [vmem:[#allocation2 + $0x1ac] ss:$16 sps:$4 sm:$0xff]   ;;  %v1962_v63 = vld [vmem:[#allocation2 + $0x1a8] ss:$16 sps:$4 sm:$0xff]  }
  0x3d   :  { %454 = vmatprep.subr.bf16.mxu0 %v1893_v12  ;;  %v1967_v0 = vld [vmem:[#allocation2 + $0x1cc] ss:$16 sps:$4 sm:$0xff]   ;;  %v1965_v1 = vld [vmem:[#allocation2 + $0x1c8] ss:$16 sps:$4 sm:$0xff]  }
  0x3e   :  { %v1970_v2 = vld [vmem:[#allocation2 + $0x1ec] ss:$16 sps:$4 sm:$0xff]   ;;  %v1968_v3 = vld [vmem:[#allocation2 + $0x1e8] ss:$16 sps:$4 sm:$0xff]  }
  0x3f   :  { %v601_v5 = vld [vmem:[%s2394_s4 + $0x8] sm:$0xff] }
  0x40   :  { %455 = vmatpush1.bf16.msra.mxu0 %v1895_v15  ;;  %609 = vperm.xlu0 %1873, %v601_v5  }
  0x41   :  { %456 = vmatprep.subr.bf16.mxu0 %v1896_v16 }
  0x44   :  { %457 = vmatpush1.bf16.msra.mxu0 %v1898_v17  ;;  %604 = vperm.xlu0 %1873, %v600_v7  }
  0x45   :  { %458 = vmatprep.subr.bf16.mxu0 %v1899_v18 }
  0x48   :  { %459 = vmatpush1.bf16.msra.mxu0 %v1901_v19 }
  0x49   :  { %460 = vmatprep.subr.bf16.mxu0 %v1902_v20 }
  0x4c   :  { %461 = vmatpush1.bf16.msra.mxu0 %v1904_v21 }
  0x4d   :  { %462 = vmatprep.subr.bf16.mxu0 %v1905_v22 }
  0x50   :  { %463 = vmatpush1.bf16.msra.mxu0 %v1907_v23 }
  0x51   :  { %464 = vmatprep.subr.bf16.mxu0 %v1908_v24 }
  0x54   :  { %465 = vmatpush1.bf16.msra.mxu0 %v1910_v25 }
  0x55   :  { %466 = vmatprep.subr.bf16.mxu0 %v1911_v26 }
  0x58   :  { %467 = vmatpush1.bf16.msra.mxu0 %v1913_v27 }
  0x59   :  { %468 = vmatprep.subr.bf16.mxu0 %v1914_v28 }
  0x5c   :  { %469 = vmatpush1.bf16.msra.mxu0 %v1916_v29 }
  0x5d   :  { %470 = vmatprep.subr.bf16.mxu0 %v1917_v30 }
  0x60   :  { %471 = vmatpush1.bf16.msra.mxu0 %v1919_v31 }
  0x61   :  { %472 = vmatprep.subr.bf16.mxu0 %v1920_v32 }
  0x64   :  { %473 = vmatpush1.bf16.msra.mxu0 %v1922_v33 }
  0x65   :  { %483 = vmatprep.subr.bf16.mxu0 %v1925_v35 }
  0x67   :  { %475 = vmatmul.mubr.bf16.vlgmr.msra.gmra.mrb[0].mxu0 %v2225_v37 }
  0x68   :  { %484 = vmatpush1.bf16.msra.mxu0 %v1923_v36  ;;  %515 = vmatprep.mubr.bf16.mxu0 %v57_v14 }
  0x69   :  { %485 = vmatprep.subr.bf16.mxu0 %v1928_v38 }
  0x6c   :  { %486 = vmatpush1.bf16.msra.mxu0 %v1926_v39 }
  0x6d   :  { %487 = vmatprep.subr.bf16.mxu0 %v1931_v40 }
  0x70   :  { %488 = vmatpush1.bf16.msra.mxu0 %v1929_v41 }
  0x71   :  { %489 = vmatprep.subr.bf16.mxu0 %v1934_v42 }
  0x74   :  { %490 = vmatpush1.bf16.msra.mxu0 %v1932_v43 }
  0x75   :  { %491 = vmatprep.subr.bf16.mxu0 %v1937_v44 }
  0x78   :  { %492 = vmatpush1.bf16.msra.mxu0 %v1935_v45 }
  0x79   :  { %493 = vmatprep.subr.bf16.mxu0 %v1940_v46 }
  0x7c   :  { %494 = vmatpush1.bf16.msra.mxu0 %v1938_v47 }
  0x7d   :  { %495 = vmatprep.subr.bf16.mxu0 %v1943_v48 }
  0x80   :  { %496 = vmatpush1.bf16.msra.mxu0 %v1941_v49 }
  0x81   :  { %497 = vmatprep.subr.bf16.mxu0 %v1946_v50 }
  0x84   :  { %498 = vmatpush1.bf16.msra.mxu0 %v1944_v51 }
  0x85   :  { %499 = vmatprep.subr.bf16.mxu0 %v1949_v52 }
  0x88   :  { %500 = vmatpush1.bf16.msra.mxu0 %v1947_v53 }
  0x89   :  { %501 = vmatprep.subr.bf16.mxu0 %v1952_v54 }
  0x8c   :  { %502 = vmatpush1.bf16.msra.mxu0 %v1950_v55 }
  0x8d   :  { %503 = vmatprep.subr.bf16.mxu0 %v1955_v56 }
  0x90   :  { %504 = vmatpush1.bf16.msra.mxu0 %v1953_v57 }
  0x91   :  { %505 = vmatprep.subr.bf16.mxu0 %v1958_v58 }
  0x94   :  { %506 = vmatpush1.bf16.msra.mxu0 %v1956_v59 }
  0x95   :  { %507 = vmatprep.subr.bf16.mxu0 %v1961_v60 }
  0x98   :  { %508 = vmatpush1.bf16.msra.mxu0 %v1959_v61 }
  0x99   :  { %509 = vmatprep.subr.bf16.mxu0 %v1964_v62 }
  0x9c   :  { %510 = vmatpush1.bf16.msra.mxu0 %v1962_v63 }
  0x9d   :  { %511 = vmatprep.subr.bf16.mxu0 %v1967_v0 }
  0xa0   :  { %512 = vmatpush1.bf16.msra.mxu0 %v1965_v1 }
  0xa1   :  { %513 = vmatprep.subr.bf16.mxu0 %v1970_v2 }
  0xa4   :  { %514 = vmatpush1.bf16.msra.mxu0 %v1968_v3 }
  0xa7   :  { %516 = vmatmul.mubr.bf16.vlgmr.msra.gmra.mrb[4].mxu0 %v2225_v37 }
  0xa8   :  { %1673 = vmatprep.mubr.f32.mxu0 %v2147_v4 }
 0x13a   :  { %v2237_v8 = vpop.f32.mrb[0].mxu0 }
 0x13b   :  { %v2239_v9 = vpop.f32.mrb[1].mxu0  ;;  %v524_v13 = vmul.f32 %v2237_v8, %v2237_v8  ;;  %v546_v14 = vand.u32 2147483647, %v2237_v8  ;;  %vm586_vm4 = vcmp.lt.f32.partialorder %v2237_v8, 0.0 }
 0x13c   :  { %v480_v10 = vpop.f32.mrb[2].mxu0  ;;  %v525_v18 = vmul.f32 %v2239_v9, %v2239_v9  ;;  %v547_v19 = vand.u32 2147483647, %v2239_v9  ;;  %vm587_vm6 = vcmp.lt.f32.partialorder %v2239_v9, 0.0 }
 0x13d   :  { %v481_v11 = vpop.f32.mrb[3].mxu0 }
 0x17a   :  { %v2241_v12 = vpop.f32.mrb[4].mxu0 }
 0x17b   :  { %v526_v15 = vmul.f32 %v2241_v12, %v2241_v12  ;;  %v544_v16 = vand.u32 2147483647, %v2241_v12  ;;  %v2249_v17 = vpop.f32.mrb[5].mxu0  ;;  %vm592_vm8 = vcmp.lt.f32.partialorder %v2241_v12, 0.0  ;;  %v598_v12 = vld [vmem:[%s2393_s3] sm:$0xff] }
 0x17c   :  { %v527_v20 = vmul.f32 %v2249_v17, %v2249_v17  ;;  %v545_v21 = vand.u32 2147483647, %v2249_v17  ;;  %v521_v22 = vpop.f32.mrb[6].mxu0  ;;  %vm593_vm11 = vcmp.lt.f32.partialorder %v2249_v17, 0.0  ;;  %v599_v17 = vld [vmem:[%s2393_s3 + $0x8] sm:$0xff] }
 0x17d   :  { %v2257_v23 = vadd.f32 %v526_v15, %v524_v13  ;;  %v548_v24 = vmax.f32 %v546_v14, %v544_v16  ;;  %v550_v25 = vmin.f32 %v546_v14, %v544_v16  ;;  %vm580_vm0 = vcmp.gt.f32.partialorder %v544_v16, %v546_v14  ;;  %v522_v26 = vpop.f32.mrb[7].mxu0  ;;  %v1974_v22 = vld [vmem:[#allocation4 + $0x10] ss:$8 sps:$4 sm:$0xff]  }
 0x17e   :  { %v2259_v27 = vadd.f32 %v527_v20, %v525_v18  ;;  %v549_v28 = vmax.f32 %v547_v19, %v545_v21  ;;  %v551_v29 = vmin.f32 %v547_v19, %v545_v21  ;;  %vm581_vm1 = vcmp.gt.f32.partialorder %v545_v21, %v547_v19  ;;  %v1971_v19 = vld [vmem:[#allocation4] ss:$8 sps:$4 sm:$0xff]   ;;  %v1973_v20 = vld [vmem:[#allocation4 + $0x4] ss:$8 sps:$4 sm:$0xff]   ;;  %v1976_v21 = vld [vmem:[#allocation4 + $0x14] ss:$8 sps:$4 sm:$0xff]  }
 0x17f   :  { %vm552_vm2 = vcmp.eq.f32.partialorder %v548_v24, 0.0  ;;  %vm532_vm5 = vcmp.eq.f32.partialorder %v2257_v23, inf  ;;  %v535_v7 = vand.u32 2147483648, %v2257_v23  ;;  %vm534_vm9 = vcmp.eq.f32.partialorder %v2257_v23, 0.0  ;;  %v1980_v26 = vld [vmem:[#allocation4 + $0x30] ss:$8 sps:$4 sm:$0xff]  }
 0x180   :  { %v554_v30 = vsel %vm552_vm2, 1.0, %v548_v24  ;;  %vm553_vm3 = vcmp.eq.f32.partialorder %v549_v28, 0.0  ;;  %vm539_vm7 = vcmp.eq.f32.partialorder %v2259_v27, inf  ;;  %v542_v8 = vand.u32 2147483648, %v2259_v27  ;;  %v1977_v24 = vld [vmem:[#allocation4 + $0x20] ss:$8 sps:$4 sm:$0xff]  }
 0x181   :  { %2067 = vrcp.f32 %v554_v30  ;;  %v555_v31 = vsel %vm553_vm3, 1.0, %v549_v28  ;;  %vm541_vm10 = vcmp.eq.f32.partialorder %v2259_v27, 0.0  ;;  %v1988_v28 = vld [vmem:[#allocation4 + $0x54] ss:$8 sps:$4 sm:$0xff]   ;;  %v1991_v30 = vld [vmem:[#allocation4 + $0x64] ss:$8 sps:$4 sm:$0xff]  }
 0x182   :  { %2069 = vrcp.f32 %v555_v31  ;;  %v1989_v31 = vld [vmem:[#allocation4 + $0x60] ss:$8 sps:$4 sm:$0xff]  }
 0x183   :  { %2071 = vrsqrt.f32 %v2257_v23 }
 0x184   :  { %2073 = vrsqrt.f32 %v2259_v27 }
 0x18b   :  { %v2068_v32 = vpop.eup %2067 }
 0x18c   :  { %v2070_v33 = vpop.eup %2069  ;;  %v557_v34 = vmul.f32 %v2068_v32, %v550_v25  ;;  %v1982_v25 = vld [vmem:[#allocation4 + $0x34] ss:$8 sps:$4 sm:$0xff]  }
 0x18d   :  { %v559_v35 = vmul.f32 %v2070_v33, %v551_v29  ;;  %v2072_v54 = vpop.eup %2071  ;;  %v1986_v29 = vld [vmem:[#allocation4 + $0x50] ss:$8 sps:$4 sm:$0xff]   ;;  %v1994_v32 = vld [vmem:[#allocation4 + $0x74] ss:$8 sps:$4 sm:$0xff]  }
 0x18e   :  { %v560_v36 = vmul.f32 %v557_v34, %v557_v34  ;;  %v2074_v56 = vpop.eup %2073  ;;  %v531_v60 = vmul.f32 %v2072_v54, %v2257_v23  ;;  %v1992_v33 = vld [vmem:[#allocation4 + $0x70] ss:$8 sps:$4 sm:$0xff]  }
 0x18f   :  { %v561_v37 = vmul.f32 %v559_v35, %v559_v35  ;;  %v538_v61 = vmul.f32 %v2074_v56, %v2259_v27 }
 0x190   :  { %v562_v38 = vmul.f32 0.0208351, %v560_v36  ;;  %v533_v2 = vsel %vm532_vm5, %v2257_v23, %v531_v60  ;;  %v1979_v23 = vld [vmem:[#allocation4 + $0x24] ss:$8 sps:$4 sm:$0xff]  }
 0x191   :  { %v563_v39 = vmul.f32 0.0208351, %v561_v37  ;;  %v540_v5 = vsel %vm539_vm7, %v2259_v27, %v538_v61  ;;  %v536_v9 = vsel %vm534_vm9, %v535_v7, %v533_v2  ;;  %v1983_v27 = vld [vmem:[#allocation4 + $0x40] ss:$8 sps:$4 sm:$0xff]  }
 0x192   :  { %v1752_v40 = vadd.f32 -0.085133, %v562_v38  ;;  %v543_v14 = vsel %vm541_vm10, %v542_v8, %v540_v5  ;;  %v2003_v38 = vld [vmem:[#allocation4 + $0xa4] ss:$8 sps:$4 sm:$0xff]  }
 0x193   :  { %v1753_v41 = vadd.f32 -0.085133, %v563_v39  ;;  %v2001_v39 = vld [vmem:[#allocation4 + $0xa0] ss:$8 sps:$4 sm:$0xff]  }
 0x194   :  { %v566_v42 = vmul.f32 %v1752_v40, %v560_v36  ;;  %v2006_v40 = vld [vmem:[#allocation4 + $0xb4] ss:$8 sps:$4 sm:$0xff]  }
 0x195   :  { %v567_v43 = vmul.f32 %v1753_v41, %v561_v37  ;;  %v2004_v41 = vld [vmem:[#allocation4 + $0xb0] ss:$8 sps:$4 sm:$0xff]  }
 0x196   :  { %v568_v44 = vadd.f32 0.180141, %v566_v42  ;;  %v2009_v42 = vld [vmem:[#allocation4 + $0xc4] ss:$8 sps:$4 sm:$0xff]  }
 0x197   :  { %v569_v45 = vadd.f32 0.180141, %v567_v43  ;;  %v2007_v43 = vld [vmem:[#allocation4 + $0xc0] ss:$8 sps:$4 sm:$0xff]  }
 0x198   :  { %v570_v46 = vmul.f32 %v568_v44, %v560_v36  ;;  %v2012_v44 = vld [vmem:[#allocation4 + $0xd4] ss:$8 sps:$4 sm:$0xff]  }
 0x199   :  { %v571_v47 = vmul.f32 %v569_v45, %v561_v37  ;;  %v2010_v45 = vld [vmem:[#allocation4 + $0xd0] ss:$8 sps:$4 sm:$0xff]  }
 0x19a   :  { %v1754_v48 = vadd.f32 -0.3302995, %v570_v46  ;;  %v2015_v46 = vld [vmem:[#allocation4 + $0xe4] ss:$8 sps:$4 sm:$0xff]  }
 0x19b   :  { %v1755_v49 = vadd.f32 -0.3302995, %v571_v47  ;;  %v2013_v47 = vld [vmem:[#allocation4 + $0xe0] ss:$8 sps:$4 sm:$0xff]  }
 0x19c   :  { %v574_v50 = vmul.f32 %v1754_v48, %v560_v36  ;;  %v2000_v36 = vld [vmem:[#allocation4 + $0x94] ss:$8 sps:$4 sm:$0xff]  }
 0x19d   :  { %v575_v51 = vmul.f32 %v1755_v49, %v561_v37  ;;  %v1998_v37 = vld [vmem:[#allocation4 + $0x90] ss:$8 sps:$4 sm:$0xff]   ;;  %v2018_v48 = vld [vmem:[#allocation4 + $0xf4] ss:$8 sps:$4 sm:$0xff]  }
 0x19e   :  { %v576_v52 = vadd.f32 0.999866, %v574_v50  ;;  %v2016_v49 = vld [vmem:[#allocation4 + $0xf0] ss:$8 sps:$4 sm:$0xff]   ;;  %v2021_v50 = vld [vmem:[#allocation4 + $0x104] ss:$8 sps:$4 sm:$0xff]  }
 0x19f   :  { %v577_v53 = vadd.f32 0.999866, %v575_v51 }
 0x1a0   :  { %v578_v55 = vmul.f32 %v576_v52, %v557_v34  ;;  %v1997_v34 = vld [vmem:[#allocation4 + $0x84] ss:$8 sps:$4 sm:$0xff]  }
 0x1a1   :  { %v579_v57 = vmul.f32 %v577_v53, %v559_v35  ;;  %v1995_v35 = vld [vmem:[#allocation4 + $0x80] ss:$8 sps:$4 sm:$0xff]   ;;  %v610_v53 = vpop.permute.xlu0 %609 }
 0x1a2   :  { %v582_v58 = vsub.f32 1.5707964, %v578_v55 }
 0x1a3   :  { %v583_v59 = vsub.f32 1.5707964, %v579_v57 }
 0x1a4   :  { %v584_v62 = vsel %vm580_vm0, %v582_v58, %v578_v55 }
 0x1a5   :  { %v585_v63 = vsel %vm581_vm1, %v583_v59, %v579_v57  ;;  %v588_v0 = vsub.f32 3.1415927, %v584_v62 }
 0x1a6   :  { %v589_v1 = vsub.f32 3.1415927, %v585_v63 }
 0x1a7   :  { %v590_v3 = vsel %vm586_vm4, %v588_v0, %v584_v62 }
 0x1a8   :  { %v591_v6 = vsel %vm587_vm6, %v589_v1, %v585_v63  ;;  %v594_v10 = vsub.f32 0.0, %v590_v3 }
 0x1a9   :  { %v595_v11 = vsub.f32 0.0, %v591_v6 }
 0x1aa   :  { %v596_v13 = vsel %vm592_vm8, %v594_v10, %v590_v3 }
 0x1ab   :  { %v597_v15 = vsel %vm593_vm11, %v595_v11, %v591_v6  ;;  %v1843_v16 = vpack.c.bf16 %v596_v13, %v536_v9 }
 0x1ac   :  { %v1841_v18 = vpack.c.bf16 %v597_v15, %v543_v14 }
 0x1ae   :  { %1842 = vmatprep.subr.bf16.mxu1 %v1841_v18 }
 0x1af   :  { %1844 = vmatpush1.bf16.msra.mxu1 %v1843_v16 }
 0x1b0   :  { %1517 = vmatprep.subr.bf16.mxu1 %v1973_v20 }
 0x1b2   :  { %1756 = vmatmul.mubr.msk.f32.vlgmr.msra.gmra.mrb[0].mxu1 %vm612_vm12, %v598_v12 }
 0x1b3   :  { %689 = vmatprep.mubr.f32.mxu1 %v2147_v4  ;;  %1518 = vmatpush1.bf16.msra.mxu1 %v1971_v19  ;;  %v1985_v4 = vld [vmem:[#allocation4 + $0x44] ss:$8 sps:$4 sm:$0xff]  }
 0x1b4   :  { %1519 = vmatprep.subr.bf16.mxu1 %v1976_v21 }
 0x1b6   :  { %1757 = vmatmul.mubr.msk.f32.gmra.mrb[2].mxu1 %vm612_vm12, %v599_v17 }
 0x1b7   :  { %1520 = vmatpush1.bf16.msra.mxu1 %v1974_v22 }
 0x1b8   :  { %1521 = vmatprep.subr.bf16.mxu1 %v1979_v23 }
 0x1bb   :  { %1522 = vmatpush1.bf16.msra.mxu1 %v1977_v24  ;;  %v2149_v24 = vmov 683565275  }
 0x1bc   :  { %1523 = vmatprep.subr.bf16.mxu1 %v1982_v25 }
 0x1bf   :  { %1524 = vmatpush1.bf16.msra.mxu1 %v1980_v26 }
 0x1c0   :  { %1525 = vmatprep.subr.bf16.mxu1 %v1985_v4 }
 0x1c3   :  { %1526 = vmatpush1.bf16.msra.mxu1 %v1983_v27  ;;  %v2150_v27 = vmov 2131351028  }
 0x1c4   :  { %1527 = vmatprep.subr.bf16.mxu1 %v1988_v28 }
 0x1c7   :  { %1528 = vmatpush1.bf16.msra.mxu1 %v1986_v29  ;;  %v2151_v29 = vmov 2102212464  }
 0x1c8   :  { %1529 = vmatprep.subr.bf16.mxu1 %v1991_v30 }
 0x1cb   :  { %1530 = vmatpush1.bf16.msra.mxu1 %v1989_v31  ;;  %v2152_v31 = vmov 920167782  }
 0x1cc   :  { %1531 = vmatprep.subr.bf16.mxu1 %v1994_v32 }
 0x1cf   :  { %1532 = vmatpush1.bf16.msra.mxu1 %v1992_v33 }
 0x1d0   :  { %1533 = vmatprep.subr.bf16.mxu1 %v1997_v34  ;;  %v2153_v34 = vmov 1326507024  }
 0x1d3   :  { %1534 = vmatpush1.bf16.msra.mxu1 %v1995_v35 }
 0x1d4   :  { %1535 = vmatprep.subr.bf16.mxu1 %v2000_v36 }
 0x1d7   :  { %1536 = vmatpush1.bf16.msra.mxu1 %v1998_v37  ;;  %v2154_v37 = vmov 2475754826  }
 0x1d8   :  { %1537 = vmatprep.subr.bf16.mxu1 %v2003_v38 }
 0x1db   :  { %1538 = vmatpush1.bf16.msra.mxu1 %v2001_v39 }
 0x1dc   :  { %1539 = vmatprep.subr.bf16.mxu1 %v2006_v40 }
 0x1df   :  { %1540 = vmatpush1.bf16.msra.mxu1 %v2004_v41 }
 0x1e0   :  { %1541 = vmatprep.subr.bf16.mxu1 %v2009_v42 }
 0x1e3   :  { %1542 = vmatpush1.bf16.msra.mxu1 %v2007_v43 }
 0x1e4   :  { %1543 = vmatprep.subr.bf16.mxu1 %v2012_v44 }
 0x1e7   :  { %1544 = vmatpush1.bf16.msra.mxu1 %v2010_v45 }
 0x1e8   :  { %1545 = vmatprep.subr.bf16.mxu1 %v2015_v46 }
 0x1eb   :  { %1546 = vmatpush1.bf16.msra.mxu1 %v2013_v47 }
 0x1ec   :  { %1547 = vmatprep.subr.bf16.mxu1 %v2018_v48 }
 0x1ef   :  { %1548 = vmatpush1.bf16.msra.mxu1 %v2016_v49 }
 0x1f0   :  { %1558 = vmatprep.subr.bf16.mxu1 %v2021_v50 }
 0x285   :  { %v2286_v51 = vpop.f32.mrb[0].mxu1 }
 0x286   :  { %v2288_v52 = vpop.f32.mrb[1].mxu1 }
 0x289   :  { %v691_v54 = vpop.f32.mrb[2].mxu1 }
 0x28a   :  { %v692_v55 = vadd.f32 %v691_v54, %v610_v53  ;;  %v693_v56 = vpop.f32.mrb[3].mxu1 }
 0x28b   :  { %v694_v57 = vadd.f32 %v693_v56, %v610_v53 }
 0x28c   :  { %v1758_v58 = vmul.f32 -1.442695, %v692_v55 }
 0x28d   :  { %v1759_v59 = vmul.f32 -1.442695, %v694_v57 }
 0x28e   :  { %2075 = vpow2.f32 %v1758_v58 }
 0x28f   :  { %2077 = vpow2.f32 %v1759_v59 }
 0x298   :  { %v2076_v60 = vpop.eup %2075 }
 0x299   :  { %v2078_v61 = vpop.eup %2077  ;;  %v704_v62 = vadd.f32 1.0, %v2076_v60 }
 0x29a   :  { %v705_v63 = vadd.f32 1.0, %v2078_v61 }
 0x29b   :  { %2079 = vrcp.f32 %v704_v62 }
 0x29c   :  { %2081 = vrcp.f32 %v705_v63 }
 0x2a5   :  { %v2290_v0 = vpop.eup %2079 }
 0x2a6   :  { %v2292_v1 = vpop.eup %2081  ;;  %v713_v2 = vand.u32 2139095040, %v2290_v0  ;;  %v710_v3 = vand.u32 2147483647, %v2290_v0 }
 0x2a7   :  { %v813_v5 = vand.u32 2147483647, %v2292_v1  ;;  %v816_v6 = vand.u32 2139095040, %v2292_v1  ;;  %vm815_vm9 = vcmp.lt.s32.totalorder %v2292_v1, 0 }
 0x2a8   :  { %v714_v7 = vshrl.u32 %v713_v2, 23  ;;  %v717_v11 = vand.u32 8388607, %v710_v3 }
 0x2a9   :  { %v817_v10 = vshrl.u32 %v816_v6, 23  ;;  %v820_v8 = vand.u32 8388607, %v813_v5  ;;  %vm2345_vm10 = vcmp.le.f32.partialorder %v813_v5, 0.7853982 }
 0x2aa   :  { %v1760_v9 = vadd.s32 4294967169, %v714_v7  ;;  %v718_v18 = vor.u32 8388608, %v717_v11 }
 0x2ab   :  { %v1764_v13 = vadd.s32 4294967169, %v817_v10  ;;  %v821_v15 = vor.u32 8388608, %v820_v8 }
 0x2ac   :  { %v720_v14 = vadd.s32 1, %v1760_v9  ;;  %v2304_v22 = vshll.u32 %v718_v18, 8 }
 0x2ad   :  { %v823_v16 = vadd.s32 1, %v1764_v13  ;;  %v2302_v21 = vshll.u32 %v821_v15, 8 }
 0x2ae   :  { %vm721_vm13 = vcmp.gt.s32.totalorder %v720_v14, 0 }
 0x2af   :  { %v722_v12 = vsel %vm721_vm13, %v720_v14, 0  ;;  %vm824_vm14 = vcmp.gt.s32.totalorder %v823_v16, 0  ;;  %vm712_vm13 = vcmp.lt.s32.totalorder %v2290_v0, 0 }
 0x2b0   :  { %v724_v17 = vand.u32 31, %v722_v12  ;;  %v825_v19 = vsel %vm824_vm14, %v823_v16, 0  ;;  %v2306_v4 = vshrl.u32 %v722_v12, 5  ;;  %vm711_vm14 = vcmp.le.f32.partialorder %v710_v3, 0.7853982 }
 0x2b1   :  { %v827_v20 = vand.u32 31, %v825_v19  ;;  %v826_v26 = vshrl.u32 %v825_v19, 5 }
 0x2b2   :  { %v725_v23 = vsub.s32 32, %v724_v17  ;;  %v727_v25 = vshll.u32 %v2149_v24, %v724_v17  ;;  %v733_v28 = vshll.u32 %v2150_v27, %v724_v17  ;;  %v736_v30 = vshll.u32 %v2151_v29, %v724_v17 }
 0x2b3   :  { %v739_v32 = vshll.u32 %v2152_v31, %v724_v17  ;;  %v828_v33 = vsub.s32 32, %v827_v20  ;;  %v830_v36 = vshll.u32 %v2149_v24, %v827_v20  ;;  %v833_v38 = vshll.u32 %v2154_v37, %v827_v20 }
 0x2b4   :  { %v740_v35 = vshrl.u32 %v2153_v34, %v725_v23  ;;  %v836_v39 = vshll.u32 %v2150_v27, %v827_v20  ;;  %v839_v43 = vshll.u32 %v2151_v29, %v827_v20  ;;  %v842_v46 = vshll.u32 %v2152_v31, %v827_v20 }
 0x2b5   :  { %v831_v40 = vshrl.u32 %v2154_v37, %v828_v33  ;;  %v834_v41 = vshrl.u32 %v2150_v27, %v828_v33  ;;  %v837_v42 = vshrl.u32 %v2151_v29, %v828_v33  ;;  %v829_v44 = vshrl.u32 %v2149_v24, %v828_v33 }
 0x2b6   :  { %v840_v45 = vshrl.u32 %v2152_v31, %v828_v33  ;;  %v843_v47 = vshrl.u32 %v2153_v34, %v828_v33  ;;  %vm845_vm15 = vcmp.lt.s32.totalorder %v826_v26, 1  ;;  %vm847_vm0 = vcmp.lt.s32.totalorder %v826_v26, 3 }
 0x2b7   :  { %v832_v48 = vor.u32 %v831_v40, %v830_v36  ;;  %v835_v49 = vor.u32 %v834_v41, %v833_v38  ;;  %v838_v50 = vor.u32 %v837_v42, %v836_v39  ;;  %vm848_vm1 = vcmp.lt.s32.totalorder %v826_v26, 4 }
 0x2b8   :  { %v841_v53 = vor.u32 %v840_v45, %v839_v43  ;;  %v844_v54 = vor.u32 %v843_v47, %v842_v46  ;;  %v741_v59 = vor.u32 %v740_v35, %v739_v32  ;;  %vm846_vm2 = vcmp.lt.s32.totalorder %v826_v26, 2 }
 0x2b9   :  { %v849_v55 = vsel %vm845_vm15, %v829_v44, %v832_v48  ;;  %v850_v56 = vsel %vm848_vm1, %v838_v50, 2102212464  ;;  %v853_v57 = vsel %vm845_vm15, %v832_v48, %v835_v49  ;;  %v857_v58 = vsel %vm845_vm15, %v835_v49, %v838_v50 }
 0x2ba   :  { %v851_v60 = vsel %vm847_vm0, %v835_v49, %v850_v56  ;;  %v854_v61 = vsel %vm848_vm1, %v841_v53, 920167782  ;;  %v858_v62 = vsel %vm848_vm1, %v844_v54, 1326507024  ;;  %v728_v6 = vshrl.u32 %v2154_v37, %v725_v23 }
 0x2bb   :  { %v855_v63 = vsel %vm847_vm0, %v838_v50, %v854_v61  ;;  %v859_v2 = vsel %vm847_vm0, %v841_v53, %v858_v62  ;;  %v852_v7 = vsel %vm846_vm2, %v849_v55, %v851_v60  ;;  %v730_v11 = vshll.u32 %v2154_v37, %v724_v17 }
 0x2bc   :  { %v856_v10 = vsel %vm846_vm2, %v853_v57, %v855_v63  ;;  %v860_v8 = vsel %vm846_vm2, %v857_v58, %v859_v2  ;;  %v729_v16 = vor.u32 %v728_v6, %v727_v25  ;;  %v731_v18 = vshrl.u32 %v2150_v27, %v725_v23 }
 0x2bd   :  { %v2309_v9 = vmul.u32.u64.low %v2302_v21, %v860_v8  ;;  %v2310_v13 = vmul.u32.u64.high %v2302_v21, %v860_v8, %v2309_v9  ;;  %v2313_v14 = vmul.u32.u64.low %v2302_v21, %v856_v10  ;;  %v2314_v15 = vmul.u32.u64.high %v2302_v21, %v856_v10, %v2313_v14 }
 0x2be   :  { %v734_v12 = vshrl.u32 %v2151_v29, %v725_v23  ;;  %v737_v19 = vshrl.u32 %v2152_v31, %v725_v23  ;;  %v868_v20 = vmul.u32 %v2302_v21, %v852_v7  ;;  %v726_v26 = vshrl.u32 %v2149_v24, %v725_v23 }
 0x2bf   :  { %vm742_vm3 = vcmp.lt.s32.totalorder %v2306_v4, 1  ;;  %vm743_vm4 = vcmp.lt.s32.totalorder %v2306_v4, 2  ;;  %v732_v17 = vor.u32 %v731_v18, %v730_v11  ;;  %vm745_vm5 = vcmp.lt.s32.totalorder %v2306_v4, 4 }
 0x2c0   :  { %v735_v32 = vor.u32 %v734_v12, %v733_v28  ;;  %v738_v33 = vor.u32 %v737_v19, %v736_v30  ;;  %vm870_vm6 = vc.u32 %v2310_v13, %v2313_v14  ;;  %v871_v34 = vadd.s32 1, %v2314_v15 }
 0x2c1   :  { %vm744_vm7 = vcmp.lt.s32.totalorder %v2306_v4, 3  ;;  %v755_v25 = vsel %vm745_vm5, %v741_v59, 1326507024  ;;  %v750_v29 = vsel %vm742_vm3, %v729_v16, %v732_v17  ;;  %v746_v31 = vsel %vm742_vm3, %v726_v26, %v729_v16 }
 0x2c2   :  { %v747_v27 = vsel %vm745_vm5, %v735_v32, 2102212464  ;;  %v751_v21 = vsel %vm745_vm5, %v738_v33, 920167782  ;;  %v754_v23 = vsel %vm742_vm3, %v732_v17, %v735_v32  ;;  %v872_v24 = vsel %vm870_vm6, %v871_v34, %v2314_v15 }
 0x2c3   :  { %v752_v35 = vsel %vm744_vm7, %v735_v32, %v751_v21  ;;  %v756_v36 = vsel %vm744_vm7, %v738_v33, %v755_v25  ;;  %v873_v28 = vadd.s32 %v872_v24, %v868_v20  ;;  %v748_v30 = vsel %vm744_vm7, %v732_v17, %v747_v27 }
 0x2c4   :  { %v753_v37 = vsel %vm743_vm4, %v750_v29, %v752_v35  ;;  %v757_v38 = vsel %vm743_vm4, %v754_v23, %v756_v36  ;;  %v749_v44 = vsel %vm743_vm4, %v746_v31, %v748_v30  ;;  %v869_v6 = vadd.s32 %v2313_v14, %v2310_v13 }
 0x2c5   :  { %v2329_v39 = vmul.u32.u64.low %v2304_v22, %v757_v38  ;;  %v2330_v40 = vmul.u32.u64.high %v2304_v22, %v757_v38, %v2329_v39  ;;  %v2333_v41 = vmul.u32.u64.low %v2304_v22, %v753_v37  ;;  %v2334_v42 = vmul.u32.u64.high %v2304_v22, %v753_v37, %v2333_v41 }
 0x2c6   :  { %v874_v43 = vadd.s32 536870912, %v873_v28  ;;  %v765_v49 = vmul.u32 %v2304_v22, %v749_v44  ;;  %vm905_vm5 = vweird.f32 %v2292_v1 }
 0x2c7   :  { %vm767_vm8 = vc.u32 %v2330_v40, %v2333_v41  ;;  %v768_v46 = vadd.s32 1, %v2334_v42  ;;  %v766_v33 = vadd.s32 %v2333_v41, %v2330_v40 }
 0x2c8   :  { %v875_v45 = vshrl.u32 %v874_v43, 30  ;;  %v605_v43 = vpop.permute.xlu0 %604 }
 0x2c9   :  { %v769_v50 = vsel %vm767_vm8, %v768_v46, %v2334_v42 }
 0x2ca   :  { %v876_v47 = vshll.u32 %v875_v45, 30  ;;  %v899_v48 = vsub.s32 4, %v875_v45  ;;  %v770_v55 = vadd.s32 %v769_v50, %v765_v49  ;;  %v688_v50 = vadd.f32 %v2288_v52, %v605_v43 }
 0x2cc   :  { %v877_v4 = vsub.s32 %v873_v28, %v876_v47  ;;  %v900_v54 = vsel %vm815_vm9, %v899_v48, %v875_v45  ;;  %v771_v22 = vadd.s32 536870912, %v770_v55 }
 0x2cd   :  { %v902_v56 = vsel %vm2345_vm10, 0, %v900_v54 }
 0x2ce   :  { %v879_v57 = vsub.s32 0, %v877_v4  ;;  %v772_v59 = vshrl.u32 %v771_v22, 30  ;;  %v1115_v39 = vadd.s32 3, %v902_v56  ;;  %v906_v44 = vand.u32 3, %v902_v56 }
 0x2cf   :  { %v697_v22 = vmax.f32 %v688_v50, 0.0  ;;  %v2061_v50 = vld [vmem:[#allocation4 + $0x1e0] ss:$8 sps:$4 sm:$0xff]  }
 0x2d0   :  { %v1765_v58 = vmin.u32 %v879_v57, %v877_v4  ;;  %v773_v61 = vshll.u32 %v772_v59, 30  ;;  %v796_v38 = vsub.s32 4, %v772_v59  ;;  %v1116_v46 = vand.u32 3, %v1115_v39  ;;  %v2048_v39 = vld [vmem:[#allocation4 + $0x194] ss:$8 sps:$4 sm:$0xff]  }
 0x2d1   :  { %vm908_vm15 = vcmp.eq.s32.totalorder %v906_v44, 0  ;;  %vm911_vm0 = vcmp.eq.s32.totalorder %v906_v44, 2  ;;  %vm907_vm3 = vcmp.lt.s32.totalorder %v906_v44, 2  ;;  %v2052_v44 = vld [vmem:[#allocation4 + $0x1b0] ss:$8 sps:$4 sm:$0xff]  }
 0x2d2   :  { %v881_v60 = vclz %v1765_v58  ;;  %v774_v63 = vsub.s32 %v770_v55, %v773_v61  ;;  %v797_v42 = vsel %vm712_vm13, %v796_v38, %v772_v59  ;;  %vm1121_vm1 = vcmp.eq.s32.totalorder %v1116_v46, 2  ;;  %v2043_v38 = vld [vmem:[#allocation4 + $0x180] ss:$8 sps:$4 sm:$0xff]  }
 0x2d3   :  { %v799_v48 = vsel %vm711_vm14, 0, %v797_v42  ;;  %vm1118_vm2 = vcmp.eq.s32.totalorder %v1116_v46, 0  ;;  %vm1117_vm4 = vcmp.lt.s32.totalorder %v1116_v46, 2  ;;  %v2049_v42 = vld [vmem:[#allocation4 + $0x1a0] ss:$8 sps:$4 sm:$0xff]  }
 0x2d4   :  { %v1766_v62 = vadd.s32 4294967294, %v881_v60  ;;  %v776_v2 = vsub.s32 0, %v774_v63  ;;  %v1011_v55 = vadd.s32 3, %v799_v48  ;;  %v2055_v46 = vld [vmem:[#allocation4 + $0x1c0] ss:$8 sps:$4 sm:$0xff]  }
 0x2d6   :  { %vm1767_vm11 = vcmp.lt.s32.totalorder %v1766_v62, 0  ;;  %v1761_v8 = vmin.u32 %v776_v2, %v774_v63 }
 0x2d7   :  { %v884_v5 = vsel %vm1767_vm11, 0, %v1766_v62  ;;  %v803_v62 = vand.u32 3, %v799_v48  ;;  %v2058_v48 = vld [vmem:[#allocation4 + $0x1d0] ss:$8 sps:$4 sm:$0xff]  }
 0x2d8   :  { %v885_v7 = vsub.s32 32, %v884_v5  ;;  %v889_v10 = vsub.s32 4294967266, %v884_v5  ;;  %v886_v11 = vshll.u32 %v877_v4, %v884_v5  ;;  %v778_v16 = vclz %v1761_v8 }
 0x2d9   :  { %v1012_v5 = vand.u32 3, %v1011_v55  ;;  %vm808_vm6 = vcmp.eq.s32.totalorder %v803_v62, 2  ;;  %vm805_vm8 = vcmp.eq.s32.totalorder %v803_v62, 0 }
 0x2da   :  { %v887_v9 = vshrl.u32 %v869_v6, %v885_v7  ;;  %v890_v15 = vadd.s32 127, %v889_v10  ;;  %v1762_v19 = vadd.s32 4294967294, %v778_v16  ;;  %v686_v10 = vadd.f32 %v2286_v51, %v605_v43  ;;  %v2054_v43 = vld [vmem:[#allocation4 + $0x1b4] ss:$8 sps:$4 sm:$0xff]  }
 0x2db   :  { %vm1017_vm7 = vcmp.eq.s32.totalorder %v1012_v5, 2  ;;  %vm1013_vm11 = vcmp.lt.s32.totalorder %v1012_v5, 2 }
 0x2dc   :  { %v888_v18 = vor.u32 %v887_v9, %v886_v11  ;;  %v891_v12 = vshll.u32 %v890_v15, 23  ;;  %vm1763_vm12 = vcmp.lt.s32.totalorder %v1762_v19, 0 }
 0x2dd   :  { %v781_v32 = vsel %vm1763_vm12, 0, %v1762_v19  ;;  %vm802_vm12 = vweird.f32 %v2290_v0 }
 0x2de   :  { %v892_v20 = vor.u32 4788187, %v891_v12  ;;  %v895_v17 = vcvt.s32.f32 %v888_v18  ;;  %v782_v34 = vsub.s32 32, %v781_v32  ;;  %v786_v25 = vsub.s32 4294967266, %v781_v32 }
 0x2df   :  { %v783_v14 = vshll.u32 %v774_v63, %v781_v32  ;;  %v696_v18 = vmax.f32 %v686_v10, 0.0  ;;  %v2019_v32 = vld [vmem:[#allocation4 + $0x100] ss:$8 sps:$4 sm:$0xff]  }
 0x2e0   :  { %v893_v26 = vand.u32 2147483647, %v892_v20  ;;  %v784_v27 = vshrl.u32 %v766_v33, %v782_v34  ;;  %v787_v29 = vadd.s32 127, %v786_v25  ;;  %v2024_v34 = vld [vmem:[#allocation4 + $0x114] ss:$8 sps:$4 sm:$0xff]  }
 0x2e2   :  { %v896_v13 = vmul.f32 %v895_v17, %v893_v26  ;;  %v785_v23 = vor.u32 %v784_v27, %v783_v14  ;;  %v788_v24 = vshll.u32 %v787_v29, 23  ;;  %v2027_v14 = vld [vmem:[#allocation4 + $0x124] ss:$8 sps:$4 sm:$0xff]   ;;  %v2025_v27 = vld [vmem:[#allocation4 + $0x120] ss:$8 sps:$4 sm:$0xff]  }
 0x2e3   :  { %v2028_v29 = vld [vmem:[#allocation4 + $0x130] ss:$8 sps:$4 sm:$0xff]  }
 0x2e4   :  { %v897_v21 = vxor.u32 2147483648, %v896_v13  ;;  %v789_v36 = vor.u32 4788187, %v788_v24  ;;  %v792_v30 = vcvt.s32.f32 %v785_v23  ;;  %v2031_v23 = vld [vmem:[#allocation4 + $0x140] ss:$8 sps:$4 sm:$0xff]  }
 0x2e5   :  { %v2036_v24 = vld [vmem:[#allocation4 + $0x154] ss:$8 sps:$4 sm:$0xff]  }
 0x2e6   :  { %v898_v31 = vsel %vm815_vm9, %v897_v21, %v896_v13  ;;  %v790_v28 = vand.u32 2147483647, %v789_v36  ;;  %vm1014_vm9 = vcmp.eq.s32.totalorder %v1012_v5, 0  ;;  %v2022_v13 = vld [vmem:[#allocation4 + $0x110] ss:$8 sps:$4 sm:$0xff]  }
 0x2e7   :  { %v901_v35 = vsel %vm2345_vm10, %v2292_v1, %v898_v31  ;;  %vm804_vm10 = vcmp.lt.s32.totalorder %v803_v62, 2  ;;  %v2033_v21 = vld [vmem:[#allocation4 + $0x144] ss:$8 sps:$4 sm:$0xff]   ;;  %v2034_v31 = vld [vmem:[#allocation4 + $0x150] ss:$8 sps:$4 sm:$0xff]  }
 0x2e8   :  { %2083 = vcosq.f32 %v901_v35  ;;  %v793_v37 = vmul.f32 %v792_v30, %v790_v28  ;;  %v2037_v36 = vld [vmem:[#allocation4 + $0x160] ss:$8 sps:$4 sm:$0xff]   ;;  %v2042_v28 = vld [vmem:[#allocation4 + $0x174] ss:$8 sps:$4 sm:$0xff]   ;;  %v2040_v30 = vld [vmem:[#allocation4 + $0x170] ss:$8 sps:$4 sm:$0xff]  }
 0x2e9   :  { %2085 = vsinq.f32 %v901_v35  ;;  %v2039_v35 = vld [vmem:[#allocation4 + $0x164] ss:$8 sps:$4 sm:$0xff]  }
 0x2ea   :  { %v794_v40 = vxor.u32 2147483648, %v793_v37 }
 0x2ec   :  { %v795_v41 = vsel %vm712_vm13, %v794_v40, %v793_v37  ;;  %v2045_v37 = vld [vmem:[#allocation4 + $0x184] ss:$8 sps:$4 sm:$0xff]   ;;  %v2046_v40 = vld [vmem:[#allocation4 + $0x190] ss:$8 sps:$4 sm:$0xff]   ;;  %vm1605_vm13 = vcmask 64512  }
 0x2ed   :  { %v798_v45 = vsel %vm711_vm14, %v2290_v0, %v795_v41  ;;  %v2030_v0 = vld [vmem:[#allocation4 + $0x134] ss:$8 sps:$4 sm:$0xff]   ;;  %v2051_v41 = vld [vmem:[#allocation4 + $0x1a4] ss:$8 sps:$4 sm:$0xff]  }
 0x2ee   :  { %2087 = vcosq.f32 %v798_v45 }
 0x2ef   :  { %2089 = vsinq.f32 %v798_v45  ;;  %v2057_v45 = vld [vmem:[#allocation4 + $0x1c4] ss:$8 sps:$4 sm:$0xff]  }
 0x2f2   :  { %v2084_v47 = vpop.eup %2083 }
 0x2f3   :  { %v2086_v49 = vpop.eup %2085  ;;  %v912_v53 = vxor.u32 2147483648, %v2084_v47 }
 0x2f4   :  { %v909_v4 = vxor.u32 2147483648, %v2086_v49 }
 0x2f5   :  { %v913_v3 = vsel %vm911_vm0, %v912_v53, %v2086_v49  ;;  %v1123_v54 = vsel %vm1121_vm1, %v912_v53, %v2086_v49  ;;  %v2063_v49 = vld [vmem:[#allocation4 + $0x1e4] ss:$8 sps:$4 sm:$0xff]   ;;  %v2066_v53 = vld [vmem:[#allocation4 + $0x1f4] ss:$8 sps:$4 sm:$0xff]  }
 0x2f6   :  { %v910_v56 = vsel %vm908_vm15, %v2084_v47, %v909_v4  ;;  %v1120_v57 = vsel %vm1118_vm2, %v2084_v47, %v909_v4  ;;  %v2060_v47 = vld [vmem:[#allocation4 + $0x1d4] ss:$8 sps:$4 sm:$0xff]   ;;  %v2064_v4 = vld [vmem:[#allocation4 + $0x1f0] ss:$8 sps:$4 sm:$0xff]  }
 0x2f7   :  { %v914_v58 = vsel %vm907_vm3, %v910_v56, %v913_v3  ;;  %v1124_v59 = vsel %vm1117_vm4, %v1120_v57, %v1123_v54  ;;  %v1599_v54 = vld [vmem:[%s2396_s6] sm:$0xff]  ;;  %v2091_v57 = vld [vmem:[%s2390_s0 + $0x8] sm:$0xff] }
 0x2f8   :  { %v915_v60 = vsel %vm905_vm5, nan, %v914_v58  ;;  %v1125_v52 = vsel %vm905_vm5, nan, %v1124_v59  ;;  %v2088_v2 = vpop.eup %2087  ;;  %1602 = vperm.xlu1 %1874, %v1599_v54   ;;  %v2092_v59 = vld [vmem:[%s2390_s0] sm:$0xff] }
 0x2f9   :  { %v917_v61 = vmul.f32 %v915_v60, %v697_v22  ;;  %v1127_v63 = vmul.f32 %v1125_v52, %v697_v22  ;;  %v2090_v7 = vpop.eup %2089  ;;  %v809_v8 = vxor.u32 2147483648, %v2088_v2 }
 0x2fa   :  { %v806_v11 = vxor.u32 2147483648, %v2090_v7 }
 0x2fb   :  { %v1129_v6 = vpack.c.bf16 %v917_v61, %v917_v61  ;;  %v810_v1 = vsel %vm808_vm6, %v809_v8, %v2090_v7  ;;  %v1019_v9 = vsel %vm1017_vm7, %v809_v8, %v2090_v7  ;;  %v1131_v25 = vpack.c.bf16 %v1127_v63, %v1127_v63  ;;  %v1196_v61 = vld [vmem:[%s2395_s5] sm:$0xff] }
 0x2fc   :  { %v807_v15 = vsel %vm805_vm8, %v2088_v2, %v806_v11  ;;  %v1016_v16 = vsel %vm1014_vm9, %v2088_v2, %v806_v11 }
 0x2fd   :  { %1549 = vmatprep.mubr.bf16.mxu1 %v1129_v6  ;;  %v811_v12 = vsel %vm804_vm10, %v807_v15, %v810_v1  ;;  %v1020_v19 = vsel %vm1013_vm11, %v1016_v16, %v1019_v9 }
 0x2fe   :  { %v812_v20 = vsel %vm802_vm12, nan, %v811_v12  ;;  %v1021_v51 = vsel %vm802_vm12, nan, %v1020_v19 }
 0x2ff   :  { %v916_v26 = vmul.f32 %v812_v20, %v696_v18  ;;  %v2368_v17 = vmul.f32 %v1021_v51, %v696_v18 }
 0x301   :  { %v1128_v33 = vpack.c.bf16 %v916_v26, %v916_v26  ;;  %v1130_v3 = vpack.c.bf16 %v2368_v17, %v2368_v17 }
 0x303   :  { %1550 = vmatmul.mubr.bf16.vlgmr.msra.gmra.mrb[4].mxu1 %v1128_v33 }
 0x304   :  { %1559 = vmatpush1.bf16.msra.mxu1 %v2019_v32  ;;  %1590 = vmatprep.mubr.bf16.mxu1 %v1131_v25 }
 0x305   :  { %1560 = vmatprep.subr.bf16.mxu1 %v2024_v34 }
 0x308   :  { %1561 = vmatpush1.bf16.msra.mxu1 %v2022_v13 }
 0x309   :  { %1562 = vmatprep.subr.bf16.mxu1 %v2027_v14 }
 0x30c   :  { %1563 = vmatpush1.bf16.msra.mxu1 %v2025_v27 }
 0x30d   :  { %1564 = vmatprep.subr.bf16.mxu1 %v2030_v0 }
 0x310   :  { %1565 = vmatpush1.bf16.msra.mxu1 %v2028_v29 }
 0x311   :  { %1566 = vmatprep.subr.bf16.mxu1 %v2033_v21 }
 0x314   :  { %1567 = vmatpush1.bf16.msra.mxu1 %v2031_v23 }
 0x315   :  { %1568 = vmatprep.subr.bf16.mxu1 %v2036_v24 }
 0x318   :  { %1569 = vmatpush1.bf16.msra.mxu1 %v2034_v31 }
 0x319   :  { %1570 = vmatprep.subr.bf16.mxu1 %v2039_v35 }
 0x31c   :  { %1571 = vmatpush1.bf16.msra.mxu1 %v2037_v36 }
 0x31d   :  { %1572 = vmatprep.subr.bf16.mxu1 %v2042_v28 }
 0x320   :  { %1573 = vmatpush1.bf16.msra.mxu1 %v2040_v30 }
 0x321   :  { %1574 = vmatprep.subr.bf16.mxu1 %v2045_v37 }
 0x324   :  { %1575 = vmatpush1.bf16.msra.mxu1 %v2043_v38 }
 0x325   :  { %1576 = vmatprep.subr.bf16.mxu1 %v2048_v39 }
 0x328   :  { %1577 = vmatpush1.bf16.msra.mxu1 %v2046_v40 }
 0x329   :  { %1578 = vmatprep.subr.bf16.mxu1 %v2051_v41 }
 0x32c   :  { %1579 = vmatpush1.bf16.msra.mxu1 %v2049_v42 }
 0x32d   :  { %1580 = vmatprep.subr.bf16.mxu1 %v2054_v43 }
 0x330   :  { %1581 = vmatpush1.bf16.msra.mxu1 %v2052_v44 }
 0x331   :  { %1582 = vmatprep.subr.bf16.mxu1 %v2057_v45 }
 0x334   :  { %1583 = vmatpush1.bf16.msra.mxu1 %v2055_v46 }
 0x335   :  { %1584 = vmatprep.subr.bf16.mxu1 %v2060_v47 }
 0x338   :  { %1585 = vmatpush1.bf16.msra.mxu1 %v2058_v48 }
 0x339   :  { %1586 = vmatprep.subr.bf16.mxu1 %v2063_v49 }
 0x33c   :  { %1587 = vmatpush1.bf16.msra.mxu1 %v2061_v50 }
 0x33d   :  { %1588 = vmatprep.subr.bf16.mxu1 %v2066_v53 }
 0x340   :  { %1589 = vmatpush1.bf16.msra.mxu1 %v2064_v4 }
 0x343   :  { %1591 = vmatmul.mubr.bf16.vlgmr.msra.gmra.mrb[4].mxu1 %v1130_v3 }
 0x377   :  { %v1603_v62 = vpop.permute.xlu1 %1602 }
 0x416   :  { %v1592_v55 = vpop.f32.mrb[4].mxu1 }
 0x417   :  { %v1594_v56 = vpop.f32.mrb[5].mxu1  ;;  %v1845_v60 = vadd.f32 %v2092_v59, %v1592_v55 }
 0x418   :  { %v1846_v22 = vadd.f32 %v2091_v57, %v1594_v56  ;;  %v1596_v58 = vpop.f32.mrb[6].mxu1 }
 0x419   :  { %v1597_v52 = vpop.f32.mrb[7].mxu1 }
 0x41a   :  { %1609 = vmatprep.subr.mxu0 %v1846_v22 }
 0x41b   :  { %1610 = vmatpush1.msra.mxu0 %v1845_v60 }
 0x41c   :  { %1840 = vmatmul.mubr.msk.f32.vlgmr.msra.gmra.mrb[8].mxu0 %vm1605_vm13, %v1196_v61 }
 0x4ef   :  { %v1675_v63 = vpop.f32.mrb[8].mxu0 }
 0x4f0   :  { %v1676_v5 = vadd.f32 %v1675_v63, %v1603_v62  ;;  %v1677_v2 = vpop.f32.mrb[9].mxu0 }
 0x4f1   :  { %v1678_v6 = vadd.f32 %v1677_v2, %v1603_v62 }
 0x4f2   :  { %1680 = vst [vmem:[%s2397_s7] sm:$0xff] %v1676_v5 }
 0x4f3   :  { %1681 = vst [vmem:[%s2397_s7 + $0x8] sm:$0xff] %v1678_v6 }
 0x4f4   :  { %1686 = vsyncpa [#allocation3], 1 }
 0x4f5   :  { %1687 = vsyncpa [#allocation5], 1 }

</bundles_post_ra>
